<compile_context>
chip_gen: v5e
topology: v5e:2x2
jax: 0.10.0
libtpu: 0.0.40
codegen_flags: <defaults>
</compile_context>

<pallas_src>
import jax
import jax.numpy as jnp
from jax.experimental import pallas as pl
from jax.experimental.pallas import tpu as pltpu

_LANE = 128  # TPU lane width; fc3 out-dim padded to this for lane-dense stores.


def ann_kernel(x_ref, w1_ref, b1_ref, w2_ref, b2_ref, w3_ref, b3_ref, o_ref):
    # Layer 1: Linear + ReLU (MXU matmul, f32 accumulation; bias+ReLU on VPU in f32)
    h1 = jnp.dot(x_ref[...], w1_ref[...], preferred_element_type=jnp.float32)
    h1 = jnp.maximum(h1 + b1_ref[...], 0.0)
    # Layer 2: Linear + ReLU
    h2 = jnp.dot(h1.astype(w2_ref.dtype), w2_ref[...],
                 preferred_element_type=jnp.float32)
    h2 = jnp.maximum(h2 + b2_ref[...], 0.0)
    # Layer 3: Linear (out-dim padded to 128 lanes -> unmasked vector stores)
    out = jnp.dot(h2.astype(w3_ref.dtype), w3_ref[...],
                  preferred_element_type=jnp.float32)
    o_ref[...] = (out + b3_ref[...]).astype(o_ref.dtype)


def ann_forward(x, params, *, block_batch=1024, input_dtype=None):
    """Fused 3-layer MLP forward, tiled over the batch dimension.

    input_dtype: optionally cast x and the weights (not biases) to e.g. jnp.bfloat16
    on v6e/v7x to halve HBM traffic; accumulation stays f32.
    """
    w1, b1, w2, b2, w3, b3 = params
    batch, feat = x.shape
    h1_dim, h2_dim, out_dim = w1.shape[1], w2.shape[1], w3.shape[1]

    # Lane-dense final layer: pad fc3 out-dim (1) to 128 with zeros.
    w3p = jnp.pad(w3, ((0, 0), (0, _LANE - out_dim)))
    b3p = jnp.pad(b3, ((0, 0), (0, _LANE - out_dim)))

    if input_dtype is not None:
        x = x.astype(input_dtype)
        w1 = w1.astype(input_dtype)
        w2 = w2.astype(input_dtype)
        w3p = w3p.astype(input_dtype)
    # Biases stay f32: VPU bias-add / ReLU in f32 (v5e has no bf16 VPU path).

    # Batch tile: at least 8 (sublane multiple), at most block_batch.
    tb = min(int(block_batch), pl.next_power_of_2(max(batch, 8)))
    padded = pl.cdiv(batch, tb) * tb
    if padded != batch:
        x = jnp.pad(x, ((0, padded - batch), (0, 0)))  # zero rows, sliced off below

    grid = (padded // tb,)

    flops = 2 * batch * (feat * h1_dim + h1_dim * h2_dim + h2_dim * out_dim)
    bytes_accessed = int(
        x.size * x.dtype.itemsize
        + batch * out_dim * 4
        + sum(int(p.size) * p.dtype.itemsize for p in (w1, b1, w2, b2, w3p, b3p))
    )

    out = pl.pallas_call(
        ann_kernel,
        out_shape=jax.ShapeDtypeStruct((padded, _LANE), jnp.float32),
        grid_spec=pltpu.PrefetchScalarGridSpec(
            num_scalar_prefetch=0,
            grid=grid,
            in_specs=[
                pl.BlockSpec((tb, feat), lambda i: (i, 0)),     # x: tiled over batch
                pl.BlockSpec(w1.shape, lambda i: (0, 0)),       # weights/biases:
                pl.BlockSpec(b1.shape, lambda i: (0, 0)),       # constant index_map ->
                pl.BlockSpec(w2.shape, lambda i: (0, 0)),       # stay VMEM-resident,
                pl.BlockSpec(b2.shape, lambda i: (0, 0)),       # no re-DMA per step
                pl.BlockSpec(w3p.shape, lambda i: (0, 0)),
                pl.BlockSpec(b3p.shape, lambda i: (0, 0)),
            ],
            out_specs=pl.BlockSpec((tb, _LANE), lambda i: (i, 0)),
        ),
        compiler_params=pltpu.CompilerParams(
            dimension_semantics=("parallel",),  # megacore sharding on v7x; no-op v5e/v6e
        ),
        cost_estimate=pl.CostEstimate(
            flops=flops, transcendentals=0, bytes_accessed=bytes_accessed),
    )(x, w1, b1, w2, b2, w3p, b3p)

    return out[:batch, :out_dim]


def init_params(key, in_features):
    """Deterministic parameter init (shapes mirror the PyTorch module)."""
    k1, k2, k3, k4, k5, k6 = jax.random.split(key, 6)

    def lin(kw, kb, fan_in, fan_out):
        bound = 1.0 / jnp.sqrt(fan_in)
        w = jax.random.uniform(kw, (fan_in, fan_out), jnp.float32, -bound, bound)
        b = jax.random.uniform(kb, (1, fan_out), jnp.float32, -bound, bound)
        return w, b

    w1, b1 = lin(k1, k2, in_features, 64)
    w2, b2 = lin(k3, k4, 64, 32)
    w3, b3 = lin(k5, k6, 32, 1)
    return (w1, b1, w2, b2, w3, b3)


def ann_reference(x, params):
    """Plain-JAX reference for correctness checking."""
    w1, b1, w2, b2, w3, b3 = params
    h1 = jnp.maximum(x @ w1 + b1, 0.0)
    h2 = jnp.maximum(h1 @ w2 + b2, 0.0)
    return h2 @ w3 + b3


if __name__ == "__main__":
    key = jax.random.PRNGKey(0)
    kx, kp, kx2 = jax.random.split(key, 3)

    in_features = 11  # wine-quality dataset feature count (X_train.shape[1])
    params = init_params(kp, in_features)

    # Small demo batch (matches the original module usage).
    batch = 8
    x = jax.random.normal(kx, (batch, in_features), dtype=jnp.float32)
    out = jax.block_until_ready(ann_forward(x, params))
    ref = ann_reference(x, params)
    assert out.shape == (batch, 1)
    assert jnp.allclose(out, ref, atol=1e-5, rtol=1e-5)

    # Larger, ragged batch exercising the grid (2 tiles of 512) and padding path.
    batch2 = 1000
    x2 = jax.random.normal(kx2, (batch2, in_features), dtype=jnp.float32)
    out2 = jax.block_until_ready(ann_forward(x2, params, block_batch=512))
    ref2 = ann_reference(x2, params)
    assert out2.shape == (batch2, 1)
    assert jnp.allclose(out2, ref2, atol=1e-5, rtol=1e-5)

    print("KERNEL_OK")
</pallas_src>

<mosaic_0001>
module attributes {stable_mosaic.version = 11 : i64} {
  func.func @ann_kernel(%arg0: i32, %arg1: memref<8x11xf32, #tpu.memory_space<vmem>>, %arg2: memref<11x64xf32, #tpu.memory_space<vmem>>, %arg3: memref<1x64xf32, #tpu.memory_space<vmem>>, %arg4: memref<64x32xf32, #tpu.memory_space<vmem>>, %arg5: memref<1x32xf32, #tpu.memory_space<vmem>>, %arg6: memref<32x128xf32, #tpu.memory_space<vmem>>, %arg7: memref<1x128xf32, #tpu.memory_space<vmem>>, %arg8: memref<8x128xf32, #tpu.memory_space<vmem>>) attributes {dimension_semantics = [#tpu.dimension_semantics<parallel>], iteration_bounds = array<i64: 1>, scalar_prefetch = 0 : i64, scratch_operands = 0 : i64, tpu.core_type = #tpu.core_type<tc>, window_params = [{transform_indices = @transform_0, window_bounds = array<i64: 8, 11>}, {pipeline_mode = #tpu.pipeline_mode<synchronous>, transform_indices = @transform_1, window_bounds = array<i64: 11, 64>}, {pipeline_mode = #tpu.pipeline_mode<synchronous>, transform_indices = @transform_2, window_bounds = array<i64: 1, 64>}, {pipeline_mode = #tpu.pipeline_mode<synchronous>, transform_indices = @transform_3, window_bounds = array<i64: 64, 32>}, {pipeline_mode = #tpu.pipeline_mode<synchronous>, transform_indices = @transform_4, window_bounds = array<i64: 1, 32>}, {pipeline_mode = #tpu.pipeline_mode<synchronous>, transform_indices = @transform_5, window_bounds = array<i64: 32, 128>}, {pipeline_mode = #tpu.pipeline_mode<synchronous>, transform_indices = @transform_6, window_bounds = array<i64: 1, 128>}, {transform_indices = @transform_7, window_bounds = array<i64: 8, 128>}]} {
    %c0 = arith.constant 0 : index
    %c0_0 = arith.constant 0 : index
    %0 = vector.load %arg1[%c0, %c0_0] : memref<8x11xf32, #tpu.memory_space<vmem>>, vector<8x11xf32>
    %c0_1 = arith.constant 0 : index
    %c0_2 = arith.constant 0 : index
    %1 = vector.load %arg2[%c0_1, %c0_2] : memref<11x64xf32, #tpu.memory_space<vmem>>, vector<11x64xf32>
    %cst = arith.constant dense<0.000000e+00> : vector<8x64xf32>
    %2 = tpu.matmul %0, %1, %cst {dimension_numbers = #tpu.dot_dimension_numbers<[1], [0], [0], [1], [0, 0, 1, 1], [], []>} : vector<8x11xf32>, vector<11x64xf32>, vector<8x64xf32> -> vector<8x64xf32>
    %c0_3 = arith.constant 0 : index
    %c0_4 = arith.constant 0 : index
    %3 = vector.load %arg3[%c0_3, %c0_4] : memref<1x64xf32, #tpu.memory_space<vmem>>, vector<1x64xf32>
    %4 = vector.broadcast %3 : vector<1x64xf32> to vector<8x64xf32>
    %5 = arith.addf %2, %4 : vector<8x64xf32>
    %cst_5 = arith.constant 0.000000e+00 : f32
    %6 = vector.broadcast %cst_5 : f32 to vector<8x64xf32>
    %7 = arith.maximumf %5, %6 : vector<8x64xf32>
    %c0_6 = arith.constant 0 : index
    %c0_7 = arith.constant 0 : index
    %8 = vector.load %arg4[%c0_6, %c0_7] : memref<64x32xf32, #tpu.memory_space<vmem>>, vector<64x32xf32>
    %cst_8 = arith.constant dense<0.000000e+00> : vector<8x32xf32>
    %9 = tpu.matmul %7, %8, %cst_8 {dimension_numbers = #tpu.dot_dimension_numbers<[1], [0], [0], [1], [0, 0, 1, 1], [], []>} : vector<8x64xf32>, vector<64x32xf32>, vector<8x32xf32> -> vector<8x32xf32>
    %c0_9 = arith.constant 0 : index
    %c0_10 = arith.constant 0 : index
    %10 = vector.load %arg5[%c0_9, %c0_10] : memref<1x32xf32, #tpu.memory_space<vmem>>, vector<1x32xf32>
    %11 = vector.broadcast %10 : vector<1x32xf32> to vector<8x32xf32>
    %12 = arith.addf %9, %11 : vector<8x32xf32>
    %cst_11 = arith.constant 0.000000e+00 : f32
    %13 = vector.broadcast %cst_11 : f32 to vector<8x32xf32>
    %14 = arith.maximumf %12, %13 : vector<8x32xf32>
    %c0_12 = arith.constant 0 : index
    %c0_13 = arith.constant 0 : index
    %15 = vector.load %arg6[%c0_12, %c0_13] : memref<32x128xf32, #tpu.memory_space<vmem>>, vector<32x128xf32>
    %cst_14 = arith.constant dense<0.000000e+00> : vector<8x128xf32>
    %16 = tpu.matmul %14, %15, %cst_14 {dimension_numbers = #tpu.dot_dimension_numbers<[1], [0], [0], [1], [0, 0, 1, 1], [], []>} : vector<8x32xf32>, vector<32x128xf32>, vector<8x128xf32> -> vector<8x128xf32>
    %c0_15 = arith.constant 0 : index
    %c0_16 = arith.constant 0 : index
    %17 = vector.load %arg7[%c0_15, %c0_16] : memref<1x128xf32, #tpu.memory_space<vmem>>, vector<1x128xf32>
    %18 = vector.broadcast %17 : vector<1x128xf32> to vector<8x128xf32>
    %19 = arith.addf %16, %18 : vector<8x128xf32>
    %c0_17 = arith.constant 0 : index
    %c0_18 = arith.constant 0 : index
    %20 = vector.load %arg8[%c0_17, %c0_18] : memref<8x128xf32, #tpu.memory_space<vmem>>, vector<8x128xf32>
    tpu.vector_store %arg8[%c0_17, %c0_18], %19 {strides = array<i32>} : memref<8x128xf32, #tpu.memory_space<vmem>>, vector<8x128xf32>,
    return
  }
  func.func @transform_0(%arg0: i32) -> (i32, i32) {
    %c0_i32 = arith.constant 0 : i32
    %c0_i32_0 = arith.constant 0 : i32
    return %arg0, %c0_i32 : i32, i32
  }
  func.func @transform_1(%arg0: i32) -> (i32, i32) {
    %c0_i32 = arith.constant 0 : i32
    %c0_i32_0 = arith.constant 0 : i32
    %c0_i32_1 = arith.constant 0 : i32
    return %c0_i32, %c0_i32_0 : i32, i32
  }
  func.func @transform_2(%arg0: i32) -> (i32, i32) {
    %c0_i32 = arith.constant 0 : i32
    %c0_i32_0 = arith.constant 0 : i32
    %c0_i32_1 = arith.constant 0 : i32
    return %c0_i32, %c0_i32_0 : i32, i32
  }
  func.func @transform_3(%arg0: i32) -> (i32, i32) {
    %c0_i32 = arith.constant 0 : i32
    %c0_i32_0 = arith.constant 0 : i32
    %c0_i32_1 = arith.constant 0 : i32
    return %c0_i32, %c0_i32_0 : i32, i32
  }
  func.func @transform_4(%arg0: i32) -> (i32, i32) {
    %c0_i32 = arith.constant 0 : i32
    %c0_i32_0 = arith.constant 0 : i32
    %c0_i32_1 = arith.constant 0 : i32
    return %c0_i32, %c0_i32_0 : i32, i32
  }
  func.func @transform_5(%arg0: i32) -> (i32, i32) {
    %c0_i32 = arith.constant 0 : i32
    %c0_i32_0 = arith.constant 0 : i32
    %c0_i32_1 = arith.constant 0 : i32
    return %c0_i32, %c0_i32_0 : i32, i32
  }
  func.func @transform_6(%arg0: i32) -> (i32, i32) {
    %c0_i32 = arith.constant 0 : i32
    %c0_i32_0 = arith.constant 0 : i32
    %c0_i32_1 = arith.constant 0 : i32
    return %c0_i32, %c0_i32_0 : i32, i32
  }
  func.func @transform_7(%arg0: i32) -> (i32, i32) {
    %c0_i32 = arith.constant 0 : i32
    %c0_i32_0 = arith.constant 0 : i32
    return %arg0, %c0_i32 : i32, i32
  }
}

</mosaic_0001>

<bundles_post_ra>
// kernel: tpu_custom_call.1
= control target key start
LH: loop header
LB: loop body
LE: loop exit
PB: predicated region body
PF: predicated region fallthrough
CT: control target
= control target key end

     0   :  { %vm38_vm0 = vcmask 1042432   ;;  %vm34_vm1 = vcmask 89088   ;;  %s281_s0 = inlined_call_operand.vmem [shape: f32[8,11], index: 0, kind: input, shape index: {}]   ;;  %s282_s1 = inlined_call_operand.vmem [shape: f32[11,64], index: 1, kind: input, shape index: {}]   ;;  %s283_s2 = inlined_call_operand.vmem [shape: f32[1,64], index: 2, kind: input, shape index: {}]   ;;  %s284_s3 = inlined_call_operand.vmem [shape: f32[64,32], index: 3, kind: input, shape index: {}]   ;;  %s285_s4 = inlined_call_operand.vmem [shape: f32[1,32], index: 4, kind: input, shape index: {}]   ;;  %s286_s5 = inlined_call_operand.vmem [shape: f32[32,128], index: 5, kind: input, shape index: {}]   ;;  %s287_s6 = inlined_call_operand.vmem [shape: f32[1,128], index: 6, kind: input, shape index: {}]   ;;  %s288_s7 = inlined_call_operand.hbm [shape: f32[8,128], index: 7, kind: output, shape index: {}]  }
   0x1   :  { %v29_v0 = vld [vmem:[%s282_s1 + $0x8] sm:$0x7]  ;;  %v28_v1 = vld [vmem:[%s282_s1] sm:$0xff]  ;;  %v70_v3 = vld [vmem:[%s284_s3 + $0x38] sm:$0xff] }
   0x2   :  { %149 = vmatpush.msk.msra.mxu0 %vm38_vm0, %v29_v0  ;;  %v27_v2 = vld [vmem:[%s281_s0] sm:$0xff]  ;;  %v69_v4 = vld [vmem:[%s284_s3 + $0x30] sm:$0xff]  ;;  %87 = vmatpush.msra.mxu1 %v70_v3  ;;  %v68_v5 = vld [vmem:[%s284_s3 + $0x28] sm:$0xff] }
   0x4   :  { %57 = vmatpush.msra.mxu0 %v28_v1  ;;  %88 = vmatpush.msra.mxu1 %v69_v4 }
   0x5   :  { %150 = vmatmul.msk.f32.vlgmr.msra.gmra.mxu0 %vm34_vm1, %v27_v2 }
   0x6   :  { %12 = vsyncpa [#allocation3], 0  ;;  %v67_v6 = vld [vmem:[%s284_s3 + $0x20] sm:$0xff]  ;;  %89 = vmatpush.msra.mxu1 %v68_v5  ;;  %v66_v7 = vld [vmem:[%s284_s3 + $0x18] sm:$0xff]  ;;  %vm75_vm2 = vcmask 523264   ;;  %vm108_vm3 = vcmask 261120  }
   0x7   :  { %v65_v8 = vld [vmem:[%s284_s3 + $0x10] sm:$0xff]  ;;  %v64_v9 = vld [vmem:[%s284_s3 + $0x8] sm:$0xff]  ;;  %v63_v10 = vld [vmem:[%s284_s3] sm:$0xff]  ;;  %s183_s10 = smov [#allocation2]  }
   0x8   :  { %90 = vmatpush.msra.mxu1 %v67_v6  ;;  %v103_v11 = vld [vmem:[%s286_s5 + $0x18] sm:$0xff]  ;;  %v154_v12 = vld [vmem:[%s283_s2] ss:$0 sm:$0xff]  ;;  %v102_v16 = vld [vmem:[%s286_s5 + $0x10] sm:$0xff]  ;;  %s138_s11 = sshll.u32 %s183_s10, 4  ;;  %s139_s11 = int_to_ptr.vmem [resolvable:$true] %s138_s11 }
   0x9   :  { %124 = vmatpush.msra.mxu2 %v103_v11  ;;  %v101_v17 = vld [vmem:[%s286_s5 + $0x8] sm:$0xff]  ;;  %v100_v18 = vld [vmem:[%s286_s5] sm:$0xff]  ;;  %s140_s5 = sshll.u32 %s288_s7, 4  ;;  %s141_s5 = int_to_ptr.hbm [resolvable:$true] %s140_s5 }
   0xa   :  { %91 = vmatpush.msra.mxu1 %v66_v7  ;;  %v155_v19 = vld [vmem:[%s285_s4] ss:$0 sm:$0xff] }
   0xb   :  { %125 = vmatpush.msra.mxu2 %v102_v16  ;;  %v156_v23 = vld [vmem:[%s287_s6] ss:$0 sm:$0xff] }
   0xc   :  { %92 = vmatpush.msra.mxu1 %v65_v8 }
   0xd   :  { %126 = vmatpush.msra.mxu2 %v101_v17 }
   0xe   :  { %93 = vmatpush.msra.mxu1 %v64_v9 }
   0xf   :  { %127 = vmatpush.msra.mxu2 %v100_v18 }
  0x10   :  { %94 = vmatpush.msra.mxu1 %v63_v10 }
  0x82   :  { %v59_v13 = vpop.f32.mrf.mxu0 }
  0x83   :  { %v60_v14 = vadd.f32 %v154_v12, %v59_v13 }
  0x85   :  { %v62_v15 = vmax.f32 %v60_v14, 0.0 }
  0x87   :  { %151 = vmatmul.msk.f32.vlgmr.msra.gmra.mxu1 %vm75_vm2, %v62_v15 }
 0x104   :  { %v96_v20 = vpop.f32.mrf.mxu1 }
 0x105   :  { %v97_v21 = vadd.f32 %v155_v19, %v96_v20 }
 0x107   :  { %v99_v22 = vmax.f32 %v97_v21, 0.0 }
 0x109   :  { %152 = vmatmul.msk.f32.vlgmr.msra.gmra.mxu2 %vm108_vm3, %v99_v22 }
 0x18c   :  { %v129_v24 = vpop.f32.mrf.mxu2 }
 0x18d   :  { %v130_v25 = vadd.f32 %v156_v23, %v129_v24 }
 0x18f   :  { %132 = vst [vmem:[#allocation2] sm:$0xff] %v130_v25 }
 0x190   :  { %143 = dma.vmem_to_hbm [thread:$0]  %s139_s11, 128, %s141_s5, [#allocation3]  }
 0x191   :  { %181 = dma.done.wait [#allocation3], 128  }
 0x192   :  { %182 = vsyncadd [#allocation3], 4294967168 }
 0x193   :  { %148 = vsyncpa [#allocation3], 1 }

</bundles_post_ra>
